<compile_context>
chip_gen: v7x
topology: tpu7x:2x2x1
jax: 0.10.0
libtpu: 0.0.40
codegen_flags: <defaults>
</compile_context>

<pallas_src>
import functools

import jax
import jax.numpy as jnp
from jax.experimental import pallas as pl
from jax.experimental.pallas import tpu as pltpu

_BN_EPS = 1e-5
_VMEM_LIMIT = 32 * 1024 * 1024


# ----------------------------- Pallas kernels --------------------------------
def _conv1x1_kernel(*refs, n_in, has_bias, relu):
    """refs = (x_0, ..., x_{n_in-1}, w, [bias], out).

    x_i : (1, Cin, TM) f32  -- summed in f32 before the matmul (fused residual)
    w   : (Cout, Cin)  bf16 -- BN scale already folded into the rows
    bias: (Cout, 1)    f32
    out : (1, Cout, TM) f32 -- pixels on the lane axis (lane-dense stores)
    """
    x = refs[0][0]
    for r in refs[1:n_in]:
        x = x + r[0]
    w_ref = refs[n_in]
    o_ref = refs[-1]
    y = jnp.dot(w_ref[...], x.astype(jnp.bfloat16),
                preferred_element_type=jnp.float32)
    if has_bias:
        y = y + refs[n_in + 1][...]
    if relu:
        y = jnp.maximum(y, 0.0)
    o_ref[0] = y.astype(o_ref.dtype)


def _fourier_conv_kernel(re_ref, im_ref, wrr, wri, wir, wii, br, bi,
                         ore_ref, oim_ref):
    """Interleaved-channel 1x1 conv + BN + ReLU on (re, im) FFT planes.

    Equivalent to conv over channels [c0_re, c0_im, c1_re, ...] but without
    ever materializing that interleaved tensor: four (Couth, Cin_half) weight
    sub-blocks act on the re/im planes and produce de-interleaved outputs.
    """
    re = re_ref[0].astype(jnp.bfloat16)
    im = im_ref[0].astype(jnp.bfloat16)
    yr = (jnp.dot(wrr[...], re, preferred_element_type=jnp.float32)
          + jnp.dot(wri[...], im, preferred_element_type=jnp.float32))
    yi = (jnp.dot(wir[...], re, preferred_element_type=jnp.float32)
          + jnp.dot(wii[...], im, preferred_element_type=jnp.float32))
    ore_ref[0] = jnp.maximum(yr + br[...], 0.0)
    oim_ref[0] = jnp.maximum(yi + bi[...], 0.0)


# ------------------------------ conv1x1 wrapper -------------------------------
def conv1x1(x_list, w_oi, scale=None, bias=None, relu=False, tm=512):
    """1x1 conv of sum(x_list) (+ folded BN + ReLU) as a lane-dense W @ X matmul.

    x_list: list of NCHW f32 tensors with identical shape (summed in-kernel).
    w_oi:   (Cout, Cin) weight of the 1x1 conv.
    """
    n, cin, h, w = x_list[0].shape
    hw = h * w
    cout = w_oi.shape[0]

    has_bias = scale is not None
    w_eff = w_oi * scale[:, None] if has_bias else w_oi      # fold BN scale
    w_bf = w_eff.astype(jnp.bfloat16)

    xs = [t.reshape(n, cin, hw) for t in x_list]             # free reshape
    tm = hw if hw <= tm else tm                               # 512 is 128-aligned
    grid = (n, pl.cdiv(hw, tm))

    x_spec = pl.BlockSpec((1, cin, tm), lambda b, i: (b, 0, i))
    in_specs = [x_spec] * len(xs) + [pl.BlockSpec((cout, cin), lambda b, i: (0, 0))]
    args = xs + [w_bf]
    if has_bias:
        in_specs.append(pl.BlockSpec((cout, 1), lambda b, i: (0, 0)))
        args.append(bias.reshape(cout, 1).astype(jnp.float32))

    bytes_acc = 4 * n * hw * (cin * len(xs) + cout) + 2 * cout * cin + 4 * cout
    out = pl.pallas_call(
        functools.partial(_conv1x1_kernel, n_in=len(xs), has_bias=has_bias,
                          relu=relu),
        out_shape=jax.ShapeDtypeStruct((n, cout, hw), jnp.float32),
        grid=grid,
        in_specs=in_specs,
        out_specs=pl.BlockSpec((1, cout, tm), lambda b, i: (b, 0, i)),
        compiler_params=pltpu.CompilerParams(
            dimension_semantics=("parallel", "parallel"),
            vmem_limit_bytes=_VMEM_LIMIT),
        cost_estimate=pl.CostEstimate(
            flops=2 * n * hw * cin * cout, transcendentals=0,
            bytes_accessed=bytes_acc),
    )(*args)
    return out.reshape(n, cout, h, w)


# ------------------------------- FourierUnit ---------------------------------
def _fold_bn(gamma, beta, mean, var):
    scale = gamma / jnp.sqrt(var + _BN_EPS)
    bias = beta - mean * scale
    return scale, bias


def fourier_unit(x, w, bn_scale, bn_bias, tm=512):
    """FourierUnit: rfft2 -> 1x1 conv + BN + ReLU on (re, im) channels -> irfft2."""
    n, c, h, wd = x.shape
    wh = wd // 2 + 1
    hw = h * wh

    # TODO(synk): rfft2/irfft2 have no Pallas TPU primitive; they stay XLA ops.
    ffted = jnp.fft.rfft2(x, norm="ortho")                    # (n, c, h, wh) c64
    re = jnp.real(ffted).reshape(n, c, hw)
    im = jnp.imag(ffted).reshape(n, c, hw)

    couth = w.shape[0] // 2
    w_eff = w * bn_scale[:, None]                             # fold BN scale
    wrr = w_eff[0::2, 0::2].astype(jnp.bfloat16)              # (couth, c)
    wri = w_eff[0::2, 1::2].astype(jnp.bfloat16)
    wir = w_eff[1::2, 0::2].astype(jnp.bfloat16)
    wii = w_eff[1::2, 1::2].astype(jnp.bfloat16)
    br = bn_bias[0::2].reshape(couth, 1).astype(jnp.float32)
    bi = bn_bias[1::2].reshape(couth, 1).astype(jnp.float32)

    tm = hw if hw <= tm else tm
    grid = (n, pl.cdiv(hw, tm))
    x_spec = pl.BlockSpec((1, c, tm), lambda b, i: (b, 0, i))
    o_spec = pl.BlockSpec((1, couth, tm), lambda b, i: (b, 0, i))
    w_spec = pl.BlockSpec((couth, c), lambda b, i: (0, 0))
    b_spec = pl.BlockSpec((couth, 1), lambda b, i: (0, 0))

    out_re, out_im = pl.pallas_call(
        _fourier_conv_kernel,
        out_shape=(jax.ShapeDtypeStruct((n, couth, hw), jnp.float32),
                   jax.ShapeDtypeStruct((n, couth, hw), jnp.float32)),
        grid=grid,
        in_specs=[x_spec, x_spec, w_spec, w_spec, w_spec, w_spec,
                  b_spec, b_spec],
        out_specs=(o_spec, o_spec),
        compiler_params=pltpu.CompilerParams(
            dimension_semantics=("parallel", "parallel"),
            vmem_limit_bytes=_VMEM_LIMIT),
        cost_estimate=pl.CostEstimate(
            flops=8 * n * hw * c * couth, transcendentals=0,
            bytes_accessed=8 * n * hw * (c + couth) + 8 * c * couth),
    )(re, im, wrr, wri, wir, wii, br, bi)

    cplx = jax.lax.complex(out_re.reshape(n, couth, h, wh),
                           out_im.reshape(n, couth, h, wh))
    return jnp.fft.irfft2(cplx, s=(h, wd), norm="ortho")


# ----------------------------- SpectralTransform -----------------------------
def spectral_transform(x, params, enable_lfu=True, stride=1):
    if stride == 2:
        n, c, h, w = x.shape
        x = jnp.mean(x.reshape(n, c, h // 2, 2, w // 2, 2), axis=(3, 5))

    # conv1: 1x1 conv -> BN -> ReLU   (Pallas, BN scale folded into W)
    s1, b1 = _fold_bn(*params["bn1"])
    x = conv1x1([x], params["w1"], s1, b1, relu=True)

    # fu
    s_fu, b_fu = _fold_bn(*params["bn_fu"])
    output = fourier_unit(x, params["w_fu"], s_fu, b_fu)

    addends = [x, output]
    if enable_lfu:
        n, c, h, w = x.shape
        split_no = 2
        sh, sw = h // split_no, w // split_no
        ctu = max(1, c // split_no ** 2)
        xs = x[:, :ctu]
        xs = jnp.concatenate(jnp.split(xs, split_no, axis=2), axis=1)
        xs = jnp.concatenate(jnp.split(xs, split_no, axis=3), axis=1)
        if xs.shape[1] < c:
            pad = c - xs.shape[1]
            xs = jnp.concatenate(
                [xs, jnp.zeros((n, pad, sh, sw), xs.dtype)], axis=1)
        elif xs.shape[1] > c:
            xs = xs[:, :c]
        s_lfu, b_lfu = _fold_bn(*params["bn_lfu"])
        xs = fourier_unit(xs, params["w_lfu"], s_lfu, b_lfu)
        xs = jnp.tile(xs, (1, 1, split_no, split_no))
        addends.append(xs)

    # conv2: 1x1 conv, no BN/ReLU; residual sum fused into the kernel.
    return conv1x1(addends, params["w2"])


# ------------------------------ parameter init --------------------------------
def init_params(key, in_channels, out_channels):
    cm = out_channels // 2
    ks = jax.random.split(key, 7)

    def w(k, o, i):
        return 0.1 * jax.random.normal(k, (o, i), jnp.float32)   # (Cout, Cin)

    def bn(k, ch):
        k1, k2, k3, k4 = jax.random.split(k, 4)
        gamma = 1.0 + 0.1 * jax.random.normal(k1, (ch,), jnp.float32)
        beta = 0.1 * jax.random.normal(k2, (ch,), jnp.float32)
        mean = 0.1 * jax.random.normal(k3, (ch,), jnp.float32)
        var = jnp.abs(1.0 + 0.1 * jax.random.normal(k4, (ch,), jnp.float32))
        return gamma, beta, mean, var

    return {
        "w1": w(ks[0], cm, in_channels),
        "bn1": bn(ks[1], cm),
        "w_fu": w(ks[2], 2 * cm, 2 * cm),
        "bn_fu": bn(ks[3], 2 * cm),
        "w_lfu": w(ks[4], 2 * cm, 2 * cm),
        "bn_lfu": bn(ks[5], 2 * cm),
        "w2": w(ks[6], out_channels, cm),
    }


if __name__ == "__main__":
    key = jax.random.PRNGKey(0)
    k_x, k_p = jax.random.split(key)

    in_channels, out_channels = 4, 8
    x = jax.random.normal(k_x, (2, in_channels, 16, 16), jnp.float32)
    params = init_params(k_p, in_channels, out_channels)

    out = spectral_transform(x, params, enable_lfu=True, stride=1)
    out = jax.block_until_ready(out)

    assert out.shape == (2, out_channels, 16, 16), out.shape
    assert bool(jnp.all(jnp.isfinite(out)))
    print("KERNEL_OK")
</pallas_src>

<mosaic_0001>
module attributes {stable_mosaic.version = 11 : i64} {
  func.func @_conv1x1_kernel(%arg0: i32, %arg1: i32, %arg2: memref<1x4x256xf32, #tpu.memory_space<vmem>>, %arg3: memref<4x4xbf16, #tpu.memory_space<vmem>>, %arg4: memref<4x1xf32, #tpu.memory_space<vmem>>, %arg5: memref<1x4x256xf32, #tpu.memory_space<vmem>>) attributes {dimension_semantics = [#tpu.dimension_semantics<parallel>, #tpu.dimension_semantics<parallel>], iteration_bounds = array<i64: 2, 1>, scalar_prefetch = 0 : i64, scratch_operands = 0 : i64, tpu.core_type = #tpu.core_type<tc>, window_params = [{transform_indices = @transform_0, window_bounds = array<i64: 1, 4, 256>}, {pipeline_mode = #tpu.pipeline_mode<synchronous>, transform_indices = @transform_1, window_bounds = array<i64: 4, 4>}, {pipeline_mode = #tpu.pipeline_mode<synchronous>, transform_indices = @transform_2, window_bounds = array<i64: 4, 1>}, {transform_indices = @transform_3, window_bounds = array<i64: 1, 4, 256>}]} {
    %c0 = arith.constant 0 : index
    %c0_0 = arith.constant 0 : index
    %c0_1 = arith.constant 0 : index
    %0 = vector.load %arg2[%c0, %c0_0, %c0_1] : memref<1x4x256xf32, #tpu.memory_space<vmem>>, vector<1x4x256xf32>
    %1 = vector.shape_cast %0 : vector<1x4x256xf32> to vector<4x256xf32>
    %c0_2 = arith.constant 0 : index
    %c0_3 = arith.constant 0 : index
    %2 = vector.load %arg3[%c0_2, %c0_3] : memref<4x4xbf16, #tpu.memory_space<vmem>>, vector<4x4xbf16>
    %3 = arith.truncf %1 : vector<4x256xf32> to vector<4x256xbf16>
    %cst = arith.constant dense<0.000000e+00> : vector<4x256xf32>
    %4 = tpu.matmul %2, %3, %cst {dimension_numbers = #tpu.dot_dimension_numbers<[1], [0], [0], [1], [0, 0, 1, 1], [], []>} : vector<4x4xbf16>, vector<4x256xbf16>, vector<4x256xf32> -> vector<4x256xf32>
    %c0_4 = arith.constant 0 : index
    %c0_5 = arith.constant 0 : index
    %5 = vector.load %arg4[%c0_4, %c0_5] : memref<4x1xf32, #tpu.memory_space<vmem>>, vector<4x1xf32>
    %6 = vector.broadcast %5 : vector<4x1xf32> to vector<4x256xf32>
    %7 = arith.addf %4, %6 : vector<4x256xf32>
    %cst_6 = arith.constant 0.000000e+00 : f32
    %8 = vector.broadcast %cst_6 : f32 to vector<4x256xf32>
    %9 = arith.maximumf %7, %8 : vector<4x256xf32>
    %c0_7 = arith.constant 0 : index
    %c0_8 = arith.constant 0 : index
    %c0_9 = arith.constant 0 : index
    %10 = vector.load %arg5[%c0_7, %c0_8, %c0_9] : memref<1x4x256xf32, #tpu.memory_space<vmem>>, vector<1x4x256xf32>
    %11 = vector.shape_cast %10 : vector<1x4x256xf32> to vector<4x256xf32>
    %12 = vector.shape_cast %9 : vector<4x256xf32> to vector<1x4x256xf32>
    tpu.vector_store %arg5[%c0_7, %c0_8, %c0_9], %12 {strides = array<i32>} : memref<1x4x256xf32, #tpu.memory_space<vmem>>, vector<1x4x256xf32>,
    return
  }
  func.func @transform_0(%arg0: i32, %arg1: i32) -> (i32, i32, i32) {
    %c0_i32 = arith.constant 0 : i32
    %c0_i32_0 = arith.constant 0 : i32
    return %arg0, %c0_i32, %arg1 : i32, i32, i32
  }
  func.func @transform_1(%arg0: i32, %arg1: i32) -> (i32, i32) {
    %c0_i32 = arith.constant 0 : i32
    %c0_i32_0 = arith.constant 0 : i32
    %c0_i32_1 = arith.constant 0 : i32
    return %c0_i32, %c0_i32_0 : i32, i32
  }
  func.func @transform_2(%arg0: i32, %arg1: i32) -> (i32, i32) {
    %c0_i32 = arith.constant 0 : i32
    %c0_i32_0 = arith.constant 0 : i32
    %c0_i32_1 = arith.constant 0 : i32
    return %c0_i32, %c0_i32_0 : i32, i32
  }
  func.func @transform_3(%arg0: i32, %arg1: i32) -> (i32, i32, i32) {
    %c0_i32 = arith.constant 0 : i32
    %c0_i32_0 = arith.constant 0 : i32
    return %arg0, %c0_i32, %arg1 : i32, i32, i32
  }
}

</mosaic_0001>

<bundles_post_ra>
// kernel: tpu_custom_call.1
= control target key start
LH: loop header
LB: loop body
LE: loop exit
PB: predicated region body
PF: predicated region fallthrough
CT: control target
= control target key end

     0   :  { %8 = vsyncpa [#allocation3], 0  ;;  %s784_s0 = inlined_call_operand.hbm [shape: f32[2,4,256], index: 0, kind: input, shape index: {}]   ;;  %s785_s1 = inlined_call_operand.vmem [shape: bf16[4,4], index: 1, kind: input, shape index: {}]   ;;  %s786_s2 = inlined_call_operand.vmem [shape: f32[4,1], index: 2, kind: input, shape index: {}]   ;;  %s787_s3 = inlined_call_operand.hbm [shape: f32[2,4,256], index: 3, kind: output, shape index: {}]  }
   0x1   :  { %10 = vsyncpa [#allocation3 + $0x1], 0 }
   0x2   :  { %11 = vsyncpa [#allocation4], 0 }
   0x3   :  { %13 = vsyncpa [#allocation4 + $0x1], 0  ;;  %s602_s12 = smov 0   ;;  %s604_s13 = smov 0  }
   0x4   :  { %s606_s14 = smov 0   ;;  %s608_s15 = smov 0  }
   0x5   :  { %s610_s16 = smov 0   ;;  %s612_s17 = smov 0  }
   0x6 LB: > { %s381_s18 = sadd.s32 4294967295, %s577_s17   ;;  %s382_s19 = sadd.s32 4294967294, %s577_s17   ;;  %s577_s17 = sphi %s612_s17, %s19_s17   ;;  %s573_s16 = sphi %s610_s16, %s803_s16   ;;  %s569_s15 = sphi %s608_s15, %s802_s15   ;;  %s565_s14 = sphi %s606_s14, %s801_s14   ;;  %s561_s13 = sphi %s604_s13, %s800_s13   ;;  %s557_s12 = sphi %s602_s12, %s799_s12  }
   0x7   : > { %s31_s20 = sadd.s32 1, %s573_s16  ;;  %s40_s21 = sadd.s32 1, %s565_s14 }
   0x8   : > { %p33_p0 = scmp.ge.s32.totalorder %s31_s20, 2  ;;  %p47_p1 = scmp.ne.s32.totalorder %s565_s14, %s561_s13 }
   0x9   : > { %p48_p2 = scmp.eq.s32.totalorder %s577_s17, 0  ;;  %p53_p3 = scmp.ne.s32.totalorder %s561_s13, %s557_s12 }
   0xa   : > { %s805_s20 = smov (%p33_p0, %s31_s20), 0  ;;  %p54_p5 = scmp.eq.s32.totalorder %s381_s18, 0 }
   0xb   : > { %p643_p4 = por %p48_p2, %p47_p1  ;;  %s35_s23 = ssub.s32 %s573_s16, %s805_s20 }
   0xc   : > { %p121_p6 = scmp.eq.s32.totalorder %s381_s18, 1  ;;  %p38_p7 = scmp.eq.s32.totalorder %s35_s23, 0 }
   0xd   : > { %p649_p8 = por %p54_p5, %p53_p3  ;;  %p127_p10 = scmp.eq.s32.totalorder %s382_s19, 1 }
   0xe   : > { %p653_p9 = por %p121_p6, %p47_p1  ;;  %p412_p13 = scmp.lt.s32.totalorder %s577_s17, 2 }
   0xf   : > { %s658_s26 = scalar_select %p38_p7, %s565_s14, %s40_s21  }
  0x10   : > { %s791_s25 = scalar_select %p653_p9, 1, 0 }
  0x11   : > { %p660_p11 = por %p127_p10, %p53_p3  ;;  %s153_s28 = sand.u32 1, %s565_s14  }
  0x12   : > { %s385_s29 = sshll.u32 %s153_s28, 3  ;;  %s398_s30 = sshll.u32 %s573_s16, 7 }
  0x13   : > { %s792_s27 = scalar_select %p660_p11, 1, 0 }
  0x14   : > { %s671_s6 = scalar_lea.hbm %s784_s0, %s398_s30  ;;  %s157_s7 = scalar_lea.vmem [#allocation2], %s385_s29 }
  0x15   : > { %s167_s8 = sshll.u32 %s157_s7, 4  ;;  %p677_p0 = pnand %p412_p13, %p643_p4  ;;  %s673_s8 = int_to_ptr.vmem [resolvable:$true] %s167_s8 }
  0x16   : > { %s154_s10 = scalar_lea.sflag [#allocation3], %s153_s28  ;;  %s465_s11 = scalar_lea.hbm %s671_s6, 128 }
  0x17   : > { %p466_p3 = scmp.ne.s32.totalorder %s671_s6, %s465_s11  ;;  %p467_p5 = pneg %p677_p0 }
  0x18   : > { %s470_s21 = scalar_lea.hbm %s784_s0, 256  ;;  %p471_p4 = scmp.lt.u32.totalorder %s671_s6, %s784_s0 }
  0x19   : > { %p468_p6 = pnand %p467_p5, %p466_p3  ;;  %p472_p10 = scmp.lt.u32.totalorder %s470_s21, %s465_s11 }
  0x1a   : > { %p474_p12 = scmp.lt.u32.totalorder %s465_s11, %s671_s6 }
  0x1b   : > { %p469_p7 = pneg %p468_p6  ;;  %p473_p13 = por %p472_p10, %p471_p4 }
  0x1d   : > { %p475_p1 = por %p474_p12, %p473_p13 }
  0x1f   : > { %p476_p2 = pnand %p475_p1, %p469_p7 }
  0x21   : > { %479 = shalt.err (!%p476_p2)
}
  0x22   : > { %s480_s28 = scalar_lea.vmem %s673_s8, 128  ;;  %s579_s29 = smov [#allocation2]  }
  0x23   : > { %p481_p3 = scmp.ne.s32.totalorder %s673_s8, %s480_s28  ;;  %s485_s30 = sshll.u32 %s579_s29, 4  ;;  %s486_s30 = int_to_ptr.vmem [resolvable:$false] %s485_s30 }
  0x24   : > { %s487_s4 = scalar_lea.vmem %s486_s30, 256  ;;  %p488_p9 = scmp.lt.s32.totalorder %s673_s8, %s486_s30 }
  0x25   : > { %p483_p6 = pnand %p481_p3, %p467_p5  ;;  %p489_p4 = scmp.lt.s32.totalorder %s487_s4, %s480_s28 }
  0x27   : > { %p484_p11 = pneg %p483_p6  ;;  %p490_p10 = por %p489_p4, %p488_p9 }
  0x29   : > { %p491_p12 = pnand %p490_p10, %p484_p11 }
  0x2b   : > { %494 = shalt.err (!%p491_p12)
}
  0x2c   : > { %407 = dma.hbm_to_vmem [thread:$0]  (!%p677_p0), %s671_s6, 128, %s673_s8, %s154_s10  }
  0x2d   : > { %p794_p1 = scmp.lt.s32.totalorder %s577_s17, 3  ;;  %p795_p2 = scmp.ge.s32.totalorder %s577_s17, 1 }
  0x2f   : > { %p173_p5 = pnand %p795_p2, %p794_p1 }
  0x30   : > { %s713_s5 = sand.u32 (!%p173_p5), 1, %s561_s13  }
  0x31   : > { %176 = sbr.rel (%p173_p5) target bundleno = 299 (0x12b), region = 32  ;;  %s389_s7 = sshll.u32 (!%p173_p5), %s713_s5, 3 }
  0x32   : > { %s179_s11 = scalar_lea.sflag (!%p173_p5), [#allocation3], %s713_s5  ;;  %s182_s9 = scalar_lea.vmem (!%p173_p5), [#allocation2], %s389_s7 }
  0x38   : > { %548 = dma.done.wait (%p649_p8), %s179_s11, 128  }
  0x39   : > { %550 = vsyncadd (%p649_p8), %s179_s11, 4294967168  ;;  %v580_v0 = vmov 0   ;;  %v208_v1 = vld [vmem:[%s182_s9] sm:$0xff]  ;;  %vm225_vm0 = vcmask 1041408   ;;  %vm221_vm1 = vcmask 31744   ;;  %s399_s18 = sshll.u32 %s569_s15, 7 }
  0x3a   : > { %264 = vmatprep.mubr.bf16.mxu0 %v580_v0  ;;  %463 = vset.pattern.permute.xlu0 %v580_v0  ;;  %v215_v2 = vld [vmem:[%s786_s2] sm:$0xf]  ;;  %v211_v3 = vcombine.high %v208_v1, %v208_v1  ;;  %v213_v4 = vpack.c.bf16 %v208_v1, %v208_v1  ;;  %s204_s19 = scalar_lea.vmem [#allocation5], %s389_s7  ;;  %s735_s28 = scalar_lea.hbm %s787_s3, %s399_s18 }
  0x3b   : > { %218 = vperm.xlu0 %463, %v215_v2   ;;  %v209_v7 = vld [vmem:[%s785_s1] sm:$0x3]  ;;  %s297_s21 = sshll.u32 %s204_s19, 4  ;;  %s281_s29 = scalar_lea.sflag [#allocation4], %s713_s5  ;;  %s737_s21 = int_to_ptr.vmem [resolvable:$true] %s297_s21 }
  0x3c   : > { %v214_v5 = vpack.c.bf16 %v211_v3, %v211_v3  ;;  %v227_v6 = vsel %vm225_vm0, %v213_v4, 0  ;;  %s495_s30 = scalar_lea.vmem %s737_s21, 128  ;;  %p796_p9 = scmp.ne.s32.totalorder %s791_s25, 0 }
  0x3d   : > { %p496_p8 = scmp.ne.s32.totalorder %s737_s21, %s495_s30  ;;  %s581_s15 = smov [#allocation5]  }
  0x3e   : > { %391 = vmatprep.subr.msk.bf16.mxu0 %vm225_vm0, %v214_v5  ;;  %s499_s4 = sshll.u32 %s581_s15, 4  ;;  %s500_s4 = int_to_ptr.vmem [resolvable:$false] %s499_s4 }
  0x3f   : > { %233 = vmatpush1.bf16.msra.mxu0 %v227_v6  ;;  %p497_p11 = pnand %p496_p8, %p796_p9  ;;  %s501_s7 = scalar_lea.vmem %s500_s4, 256 }
  0x40   : > { %p502_p7 = scmp.lt.s32.totalorder %s737_s21, %s500_s4  ;;  %p503_p13 = scmp.lt.s32.totalorder %s501_s7, %s495_s30 }
  0x41   : > { %p498_p0 = pneg %p497_p11 }
  0x42   : > { %392 = vmatmul.mubr.msk.bf16.vlgmr.msra.gmra.mrb[0].mxu0 %vm221_vm1, %v209_v7  ;;  %p504_p3 = por %p503_p13, %p502_p7 }
  0x44   : > { %p505_p6 = pnand %p504_p3, %p498_p0 }
  0xba   : > { %v219_v8 = vpop.permute.xlu0 %218 }
 0x115   : > { %v266_v9 = vpop.f32.mrb[0].mxu0 }
 0x116   : > { %v267_v10 = vadd.f32 %v266_v9, %v219_v8  ;;  %v268_v11 = vpop.f32.mrb[1].mxu0 }
 0x117   : > { %v269_v12 = vadd.f32 %v268_v11, %v219_v8  ;;  %v270_v13 = vpop.f32.mrb[2].mxu0 }
 0x118   : > { %v273_v14 = vmax.f32 %v267_v10, 0.0  ;;  %v271_v15 = vpop.f32.mrb[3].mxu0 }
 0x119   : > { %v274_v16 = vmax.f32 %v269_v12, 0.0 }
 0x11b   : > { %v277_v17 = vcombine.low %v273_v14, %v274_v16 }
 0x11d   : > { %279 = vst [vmem:[%s204_s19] sm:$0xff] %v277_v17 }
 0x11e   : > { %508 = shalt.err (!%p505_p6)
}
 0x11f   : > { %s509_s5 = scalar_lea.hbm %s735_s28, 128  ;;  %s513_s6 = scalar_lea.hbm %s787_s3, 256 }
 0x120   : > { %p510_p4 = scmp.ne.s32.totalorder %s735_s28, %s509_s5  ;;  %p514_p1 = scmp.lt.u32.totalorder %s735_s28, %s787_s3 }
 0x121   : > { %p515_p2 = scmp.lt.u32.totalorder %s513_s6, %s509_s5  ;;  %p517_p8 = scmp.lt.u32.totalorder %s509_s5, %s735_s28 }
 0x122   : > { %p511_p10 = pnand %p510_p4, %p796_p9 }
 0x123   : > { %p516_p5 = por %p515_p2, %p514_p1 }
 0x124   : > { %p512_p12 = pneg %p511_p10 }
 0x125   : > { %p518_p11 = por %p517_p8, %p516_p5 }
 0x127   : > { %p519_p0 = pnand %p518_p11, %p512_p12 }
 0x129   : > { %522 = shalt.err (!%p519_p0)
}
 0x12a   : > { %402 = dma.vmem_to_hbm [thread:$0]  (%p796_p9), %s737_s21, 128, %s735_s28, %s281_s29  }
 0x12b PF: > { %s309_s10 = sand.u32 1, %s557_s12   ;;  %p797_p7 = scmp.ne.s32.totalorder %s792_s27, 0 }
 0x12c   : > { %p798_p13 = scmp.ge.s32.totalorder %s577_s17, 2  ;;  %s310_s18 = scalar_lea.sflag [#allocation4], %s309_s10 }
 0x12e   : > { %p409_p3 = pnand %p798_p13, %p797_p7 }
 0x130   : > { %552 = dma.done.wait (!%p409_p3), %s310_s18, 128  }
 0x131   : > { %554 = vsyncadd (!%p409_p3), %s310_s18, 4294967168  ;;  %s19_s17 = sadd.s32 1, %s577_s17   ;;  %s799_s12 = smov %s561_s13 }
 0x132   : > { %p16_p6 = scmp.ge.s32.totalorder %s19_s17, 4   ;;  %s800_s13 = smov %s565_s14 }
 0x133   : > { %s801_s14 = smov %s658_s26  ;;  %s802_s15 = smov %s573_s16 }
 0x134   : > { %s803_s16 = smov %s805_s20  ;;  %18 = sbr.rel (!%p16_p6) target bundleno = 6 (0x6), region = 77 }
 0x13b   :  { %315 = vsyncpa [#allocation3], 1 }
 0x13c   :  { %317 = vsyncpa [#allocation3 + $0x1], 1 }
 0x13d   :  { %318 = vsyncpa [#allocation4], 1 }
 0x13e   :  { %320 = vsyncpa [#allocation4 + $0x1], 1 }

</bundles_post_ra>
